<compile_context>
chip_gen: v7x
topology: tpu7x:2x2x1
jax: 0.10.0
libtpu: 0.0.40
codegen_flags: <defaults>
</compile_context>

<pallas_src>
import jax
import jax.numpy as jnp
from jax.experimental import pallas as pl
from jax.experimental.pallas import tpu as pltpu

D_IN = 1024
D_HID = 64
D_HID_PAD = 128   # hidden padded to a full 128-lane vreg
D_OUT = 36
D_OUT_PAD = 128   # lane-dense padded output width (multiple of 128)
NEG = -1.0e30     # finite "-inf" baked into the padded fc2 bias columns


def net71_kernel(x_ref, w1_ref, b1_ref, w2_ref, b2_ref, o_ref):
    # x: (TB, 1024) f32/bf16 | w1: (1024, 128) bf16 | b1: (1, 128) f32
    # w2: (128, 128) bf16    | b2: (1, 128) f32 (pad cols = -1e30) | o: (TB, 128) bf16
    x = x_ref[...].astype(jnp.bfloat16)   # in-kernel cast: no extra HBM convert pass

    # fc1 + ReLU  (bf16 MXU, f32 accumulate, f32 epilogue); pad cols of h are 0
    h = jnp.dot(x, w1_ref[...], preferred_element_type=jnp.float32)   # (TB, 128)
    h = jnp.maximum(h + b1_ref[...], 0.0)

    # fc2 into a 128-wide (lane-dense) padded logits block; pad columns get the
    # -1e30 bias -> they vanish in the softmax (exp underflows to 0), no iota/where.
    logits = jnp.dot(h.astype(jnp.bfloat16), w2_ref[...],
                     preferred_element_type=jnp.float32)              # (TB, 128)
    logits = logits + b2_ref[...]

    # numerically stable log_softmax along the last axis (exp/log go to the EUP)
    m = jnp.max(logits, axis=-1, keepdims=True)
    shifted = logits - m
    lse = jnp.log(jnp.sum(jnp.exp(shifted), axis=-1, keepdims=True))
    o_ref[...] = (shifted - lse).astype(o_ref.dtype)


def prepare_params(w1, b1, w2, b2):
    """One-time param prep: bf16 cast + lane padding (do NOT redo this per call).

    w1: (1024, 64), b1: (64,), w2: (64, 36), b2: (36,)  (weights already stored
    as (in_features, out_features), i.e. transposed vs. PyTorch's Linear.weight).
    """
    w1_p = jnp.zeros((D_IN, D_HID_PAD), jnp.bfloat16)
    w1_p = w1_p.at[:, :D_HID].set(w1.astype(jnp.bfloat16))
    b1_p = jnp.zeros((1, D_HID_PAD), jnp.float32)
    b1_p = b1_p.at[:, :D_HID].set(jnp.reshape(b1, (1, D_HID)).astype(jnp.float32))

    w2_p = jnp.zeros((D_HID_PAD, D_OUT_PAD), jnp.bfloat16)
    w2_p = w2_p.at[:D_HID, :D_OUT].set(w2.astype(jnp.bfloat16))
    # Bake the pad-column mask into the bias: columns >= 36 get -1e30.
    b2_p = jnp.full((1, D_OUT_PAD), NEG, jnp.float32)
    b2_p = b2_p.at[:, :D_OUT].set(jnp.reshape(b2, (1, D_OUT)).astype(jnp.float32))
    return w1_p, b1_p, w2_p, b2_p


def net71_forward(x, params, *, tb=None, out_dtype=jnp.bfloat16):
    """x: (B, 1024) f32 or bf16 (bf16 from the caller halves x HBM traffic).
    params: output of prepare_params(). Returns (B, 36) in `out_dtype`."""
    w1_p, b1_p, w2_p, b2_p = params
    B = x.shape[0]
    x_item = jnp.dtype(x.dtype).itemsize
    o_item = jnp.dtype(out_dtype).itemsize

    # Batch tile: big enough to amortize ~0.35us/step overhead, small enough that
    # double-buffered x + output tiles + resident weights stay within ~10 MiB.
    if tb is None:
        tb = 2048 if x_item <= 2 else 1024
    tb = max(8, min(tb, ((B + 7) // 8) * 8))
    if B >= 16:
        # Keep >= 2 grid steps so the "parallel" batch axis spreads over both v7x TCs.
        half = ((((B + 1) // 2) + 7) // 8) * 8
        tb = min(tb, half)
    grid = (pl.cdiv(B, tb),)   # ragged last tile handled by Pallas boundary masking

    weight_bytes = (w1_p.size * 2 + w2_p.size * 2 + (b1_p.size + b2_p.size) * 4)
    # Double-buffered streaming tiles + (double-buffered) resident weights, + margin.
    vmem_need = 2 * tb * D_IN * x_item + 2 * tb * D_OUT_PAD * o_item + 2 * weight_bytes
    vmem_limit = int(min(max(vmem_need * 5 // 4, 16 * 1024 * 1024), 30 * 1024 * 1024))

    out = pl.pallas_call(
        net71_kernel,
        out_shape=jax.ShapeDtypeStruct((B, D_OUT_PAD), out_dtype),
        grid=grid,
        in_specs=[
            pl.BlockSpec((tb, D_IN), lambda i: (i, 0)),            # x streams per tile
            pl.BlockSpec((D_IN, D_HID_PAD), lambda i: (0, 0)),     # weights resident
            pl.BlockSpec((1, D_HID_PAD), lambda i: (0, 0)),
            pl.BlockSpec((D_HID_PAD, D_OUT_PAD), lambda i: (0, 0)),
            pl.BlockSpec((1, D_OUT_PAD), lambda i: (0, 0)),
        ],
        out_specs=pl.BlockSpec((tb, D_OUT_PAD), lambda i: (i, 0)),
        compiler_params=pltpu.CompilerParams(
            dimension_semantics=("parallel",),
            vmem_limit_bytes=vmem_limit,
        ),
        cost_estimate=pl.CostEstimate(
            flops=2 * B * (D_IN * D_HID_PAD + D_HID_PAD * D_OUT_PAD),
            transcendentals=B * (D_OUT_PAD + 1),
            bytes_accessed=(B * D_IN * x_item
                            + B * D_OUT_PAD * o_item
                            + weight_bytes),
        ),
    )(x, w1_p, b1_p, w2_p, b2_p)

    # NOTE: callers that can consume the padded (B, 128) buffer directly (ignoring
    # columns >= 36, which hold ~-1e30) can skip this slice and save one HBM pass.
    return out[:, :D_OUT]


def init_params(key):
    # Deterministic init mimicking PyTorch Linear default: U(-1/sqrt(fan_in), +1/sqrt(fan_in))
    k1, k2, k3, k4 = jax.random.split(key, 4)
    bound1 = 1.0 / jnp.sqrt(1024.0)
    bound2 = 1.0 / jnp.sqrt(64.0)
    w1 = jax.random.uniform(k1, (1024, 64), jnp.float32, -bound1, bound1)
    b1 = jax.random.uniform(k2, (64,), jnp.float32, -bound1, bound1)
    w2 = jax.random.uniform(k3, (64, 36), jnp.float32, -bound2, bound2)
    b2 = jax.random.uniform(k4, (36,), jnp.float32, -bound2, bound2)
    return w1, b1, w2, b2


def net71_reference(x, w1, b1, w2, b2):
    h = jnp.maximum(x @ w1 + b1[None, :], 0.0)
    logits = h @ w2 + b2[None, :]
    return jax.nn.log_softmax(logits, axis=1)


if __name__ == "__main__":
    key = jax.random.PRNGKey(0)
    k_x, k_p = jax.random.split(key)

    B = 8
    x = jax.random.normal(k_x, (B, 1024), jnp.float32)
    w1, b1, w2, b2 = init_params(k_p)

    params = prepare_params(w1, b1, w2, b2)   # one-time bf16 cast + padding
    out = net71_forward(x, params)
    out = jax.block_until_ready(out)

    assert out.shape == (B, 36)

    out_f32 = out.astype(jnp.float32)

    # log_softmax rows must exponentiate-sum to ~1 (bf16 output -> relaxed tol)
    row_sums = jnp.exp(out_f32).sum(axis=1)
    assert jnp.allclose(row_sums, 1.0, atol=2e-2), float(jnp.max(jnp.abs(row_sums - 1.0)))

    # match f32 reference (intentional bf16 weights/inputs/output -> relaxed tolerance)
    ref = net71_reference(x, w1, b1, w2, b2)
    assert jnp.allclose(out_f32, ref, atol=1e-1), float(jnp.max(jnp.abs(out_f32 - ref)))

    print("KERNEL_OK")
</pallas_src>

<mosaic_0001>
module attributes {stable_mosaic.version = 11 : i64} {
  func.func @net71_kernel(%arg0: i32, %arg1: memref<8x1024xf32, #tpu.memory_space<vmem>>, %arg2: memref<1024x128xbf16, #tpu.memory_space<vmem>>, %arg3: memref<1x128xf32, #tpu.memory_space<vmem>>, %arg4: memref<128x128xbf16, #tpu.memory_space<vmem>>, %arg5: memref<1x128xf32, #tpu.memory_space<vmem>>, %arg6: memref<8x128xbf16, #tpu.memory_space<vmem>>) attributes {dimension_semantics = [#tpu.dimension_semantics<parallel>], iteration_bounds = array<i64: 1>, scalar_prefetch = 0 : i64, scratch_operands = 0 : i64, tpu.core_type = #tpu.core_type<tc>, window_params = [{transform_indices = @transform_0, window_bounds = array<i64: 8, 1024>}, {pipeline_mode = #tpu.pipeline_mode<synchronous>, transform_indices = @transform_1, window_bounds = array<i64: 1024, 128>}, {pipeline_mode = #tpu.pipeline_mode<synchronous>, transform_indices = @transform_2, window_bounds = array<i64: 1, 128>}, {pipeline_mode = #tpu.pipeline_mode<synchronous>, transform_indices = @transform_3, window_bounds = array<i64: 128, 128>}, {pipeline_mode = #tpu.pipeline_mode<synchronous>, transform_indices = @transform_4, window_bounds = array<i64: 1, 128>}, {transform_indices = @transform_5, window_bounds = array<i64: 8, 128>}]} {
    %c0 = arith.constant 0 : index
    %c0_0 = arith.constant 0 : index
    %0 = vector.load %arg1[%c0, %c0_0] : memref<8x1024xf32, #tpu.memory_space<vmem>>, vector<8x1024xf32>
    %1 = arith.truncf %0 : vector<8x1024xf32> to vector<8x1024xbf16>
    %c0_1 = arith.constant 0 : index
    %c0_2 = arith.constant 0 : index
    %2 = vector.load %arg2[%c0_1, %c0_2] : memref<1024x128xbf16, #tpu.memory_space<vmem>>, vector<1024x128xbf16>
    %cst = arith.constant dense<0.000000e+00> : vector<8x128xf32>
    %3 = tpu.matmul %1, %2, %cst {dimension_numbers = #tpu.dot_dimension_numbers<[1], [0], [0], [1], [0, 0, 1, 1], [], []>} : vector<8x1024xbf16>, vector<1024x128xbf16>, vector<8x128xf32> -> vector<8x128xf32>
    %c0_3 = arith.constant 0 : index
    %c0_4 = arith.constant 0 : index
    %4 = vector.load %arg3[%c0_3, %c0_4] : memref<1x128xf32, #tpu.memory_space<vmem>>, vector<1x128xf32>
    %5 = vector.broadcast %4 : vector<1x128xf32> to vector<8x128xf32>
    %6 = arith.addf %3, %5 : vector<8x128xf32>
    %cst_5 = arith.constant 0.000000e+00 : f32
    %7 = vector.broadcast %cst_5 : f32 to vector<8x128xf32>
    %8 = arith.maximumf %6, %7 : vector<8x128xf32>
    %9 = arith.truncf %8 : vector<8x128xf32> to vector<8x128xbf16>
    %c0_6 = arith.constant 0 : index
    %c0_7 = arith.constant 0 : index
    %10 = vector.load %arg4[%c0_6, %c0_7] : memref<128x128xbf16, #tpu.memory_space<vmem>>, vector<128x128xbf16>
    %cst_8 = arith.constant dense<0.000000e+00> : vector<8x128xf32>
    %11 = tpu.matmul %9, %10, %cst_8 {dimension_numbers = #tpu.dot_dimension_numbers<[1], [0], [0], [1], [0, 0, 1, 1], [], []>} : vector<8x128xbf16>, vector<128x128xbf16>, vector<8x128xf32> -> vector<8x128xf32>
    %c0_9 = arith.constant 0 : index
    %c0_10 = arith.constant 0 : index
    %12 = vector.load %arg5[%c0_9, %c0_10] : memref<1x128xf32, #tpu.memory_space<vmem>>, vector<1x128xf32>
    %13 = vector.broadcast %12 : vector<1x128xf32> to vector<8x128xf32>
    %14 = arith.addf %11, %13 : vector<8x128xf32>
    %cst_11 = arith.constant dense<0xFF800000> : vector<8xf32>
    %15 = vector.multi_reduction <maximumf>, %14, %cst_11 [1] : vector<8x128xf32> to vector<8xf32>
    %16 = vector.shape_cast %15 : vector<8xf32> to vector<8x1xf32>
    %17 = vector.broadcast %16 : vector<8x1xf32> to vector<8x128xf32>
    %18 = arith.subf %14, %17 : vector<8x128xf32>
    %19 = math.exp %18 : vector<8x128xf32>
    %cst_12 = arith.constant dense<0.000000e+00> : vector<8xf32>
    %20 = vector.multi_reduction <add>, %19, %cst_12 [1] : vector<8x128xf32> to vector<8xf32>
    %21 = vector.shape_cast %20 : vector<8xf32> to vector<8x1xf32>
    %22 = math.log %21 : vector<8x1xf32>
    %23 = vector.broadcast %22 : vector<8x1xf32> to vector<8x128xf32>
    %24 = arith.subf %18, %23 : vector<8x128xf32>
    %25 = arith.truncf %24 : vector<8x128xf32> to vector<8x128xbf16>
    %c0_13 = arith.constant 0 : index
    %c0_14 = arith.constant 0 : index
    %26 = vector.load %arg6[%c0_13, %c0_14] : memref<8x128xbf16, #tpu.memory_space<vmem>>, vector<8x128xbf16>
    tpu.vector_store %arg6[%c0_13, %c0_14], %25 {strides = array<i32>} : memref<8x128xbf16, #tpu.memory_space<vmem>>, vector<8x128xbf16>,
    return
  }
  func.func @transform_0(%arg0: i32) -> (i32, i32) {
    %c0_i32 = arith.constant 0 : i32
    %c0_i32_0 = arith.constant 0 : i32
    return %arg0, %c0_i32 : i32, i32
  }
  func.func @transform_1(%arg0: i32) -> (i32, i32) {
    %c0_i32 = arith.constant 0 : i32
    %c0_i32_0 = arith.constant 0 : i32
    %c0_i32_1 = arith.constant 0 : i32
    return %c0_i32, %c0_i32_0 : i32, i32
  }
  func.func @transform_2(%arg0: i32) -> (i32, i32) {
    %c0_i32 = arith.constant 0 : i32
    %c0_i32_0 = arith.constant 0 : i32
    %c0_i32_1 = arith.constant 0 : i32
    return %c0_i32, %c0_i32_0 : i32, i32
  }
  func.func @transform_3(%arg0: i32) -> (i32, i32) {
    %c0_i32 = arith.constant 0 : i32
    %c0_i32_0 = arith.constant 0 : i32
    %c0_i32_1 = arith.constant 0 : i32
    return %c0_i32, %c0_i32_0 : i32, i32
  }
  func.func @transform_4(%arg0: i32) -> (i32, i32) {
    %c0_i32 = arith.constant 0 : i32
    %c0_i32_0 = arith.constant 0 : i32
    %c0_i32_1 = arith.constant 0 : i32
    return %c0_i32, %c0_i32_0 : i32, i32
  }
  func.func @transform_5(%arg0: i32) -> (i32, i32) {
    %c0_i32 = arith.constant 0 : i32
    %c0_i32_0 = arith.constant 0 : i32
    return %arg0, %c0_i32 : i32, i32
  }
}

</mosaic_0001>

<bundles_post_ra>
// kernel: tpu_custom_call.1
= control target key start
LH: loop header
LB: loop body
LE: loop exit
PB: predicated region body
PF: predicated region fallthrough
CT: control target
= control target key end

     0   :  { %10 = vsyncpa [#allocation3], 0  ;;  %s1364_s0 = inlined_call_operand.hbm [shape: f32[8,1024], index: 0, kind: input, shape index: {}]   ;;  %s1365_s1 = inlined_call_operand.hbm [shape: bf16[1024,128], index: 1, kind: input, shape index: {}]   ;;  %s1366_s2 = inlined_call_operand.vmem [shape: f32[1,128], index: 2, kind: input, shape index: {}]   ;;  %s1367_s3 = inlined_call_operand.hbm [shape: bf16[128,128], index: 3, kind: input, shape index: {}]   ;;  %s1368_s4 = inlined_call_operand.vmem [shape: f32[1,128], index: 4, kind: input, shape index: {}]   ;;  %s1369_s5 = inlined_call_operand.hbm [shape: bf16[8,128], index: 5, kind: output, shape index: {}]  }
   0x1   :  { %11 = vsyncpa [#allocation6], 0 }
   0x2   :  { %12 = vsyncpa [#allocation4], 0  ;;  %s1266_s18 = smov [#allocation5]   ;;  %s1172_s22 = scalar_lea.hbm %s1365_s1, 8192 }
   0x3   :  { %s28_s19 = sshll.u32 %s1266_s18, 4  ;;  %p1173_p0 = scmp.ne.s32.totalorder %s1365_s1, %s1172_s22  ;;  %s29_s19 = int_to_ptr.vmem [resolvable:$true] %s28_s19 }
   0x4   :  { %p1176_p1 = scmp.lt.u32.totalorder %s1172_s22, %s1365_s1 }
   0x6   :  { %p1178_p2 = pnand %p1176_p1, %p1173_p0 }
   0x8   :  { %1181 = shalt.err (!%p1178_p2)
}
   0x9   :  { %s1182_s27 = scalar_lea.vmem %s29_s19, 8192  ;;  %p1187_p4 = scmp.lt.s32.totalorder %s29_s19, %s29_s19 }
   0xa   :  { %p1183_p3 = scmp.ne.s32.totalorder %s29_s19, %s1182_s27  ;;  %p1188_p5 = scmp.lt.s32.totalorder %s1182_s27, %s1182_s27 }
   0xc   :  { %p1189_p6 = por %p1188_p5, %p1187_p4 }
   0xe   :  { %p1190_p7 = pnand %p1189_p6, %p1183_p3 }
  0x10   :  { %1193 = shalt.err (!%p1190_p7)
}
  0x11   :  { %s1267_s28 = smov 64   ;;  %s1268_s29 = smov 4  }
  0x12   :  { %34 = dma.hbm_to_vmem [thread:$0]  %s1365_s1, 8192, %s29_s19, [#allocation6], %s1267_s28, %s1267_s28, %s1268_s29  }
  0x13   :  { %s1269_s7 = smov [#allocation2]   ;;  %s1270_s9 = smov [#allocation7]  }
  0x14   :  { %s19_s8 = sshll.u32 %s1269_s7, 4  ;;  %s42_s10 = sshll.u32 %s1270_s9, 4  ;;  %s20_s8 = int_to_ptr.vmem [resolvable:$true] %s19_s8  ;;  %s43_s10 = int_to_ptr.vmem [resolvable:$true] %s42_s10 }
  0x15   :  { %s1194_s13 = scalar_lea.hbm %s1364_s0, 1024 }
  0x16   :  { %p1195_p8 = scmp.ne.s32.totalorder %s1364_s0, %s1194_s13  ;;  %p1198_p9 = scmp.lt.u32.totalorder %s1194_s13, %s1364_s0 }
  0x18   :  { %p1200_p10 = pnand %p1198_p9, %p1195_p8 }
  0x1a   :  { %1203 = shalt.err (!%p1200_p10)
}
  0x1b   :  { %s1204_s1 = scalar_lea.vmem %s20_s8, 1024  ;;  %p1209_p12 = scmp.lt.s32.totalorder %s20_s8, %s20_s8 }
  0x1c   :  { %p1205_p11 = scmp.ne.s32.totalorder %s20_s8, %s1204_s1  ;;  %p1210_p13 = scmp.lt.s32.totalorder %s1204_s1, %s1204_s1 }
  0x1e   :  { %p1211_p0 = por %p1210_p13, %p1209_p12 }
  0x20   :  { %p1212_p1 = pnand %p1211_p0, %p1205_p11 }
  0x22   :  { %1215 = shalt.err (!%p1212_p1)
}
  0x23   :  { %22 = dma.hbm_to_vmem [thread:$0]  %s1364_s0, 1024, %s20_s8, [#allocation3]  }
  0x24   :  { %s1216_s22 = scalar_lea.hbm %s1367_s3, 1024 }
  0x25   :  { %p1217_p2 = scmp.ne.s32.totalorder %s1367_s3, %s1216_s22  ;;  %p1220_p3 = scmp.lt.u32.totalorder %s1216_s22, %s1367_s3 }
  0x27   :  { %p1222_p4 = pnand %p1220_p3, %p1217_p2 }
  0x29   :  { %1225 = shalt.err (!%p1222_p4)
}
  0x2a   :  { %s1226_s27 = scalar_lea.vmem %s43_s10, 1024  ;;  %p1231_p6 = scmp.lt.s32.totalorder %s43_s10, %s43_s10 }
  0x2b   :  { %p1227_p5 = scmp.ne.s32.totalorder %s43_s10, %s1226_s27  ;;  %p1232_p7 = scmp.lt.s32.totalorder %s1226_s27, %s1226_s27 }
  0x2d   :  { %p1233_p8 = por %p1232_p7, %p1231_p6 }
  0x2f   :  { %p1234_p9 = pnand %p1233_p8, %p1227_p5 }
  0x31   :  { %1237 = shalt.err (!%p1234_p9)
}
  0x32   :  { %48 = dma.hbm_to_vmem [thread:$0]  %s1367_s3, 1024, %s43_s10, [#allocation6], %s1267_s28, %s1267_s28, %s1268_s29  }
  0x33   :  { %1260 = dma.done.wait [#allocation3], 1024  }
  0x34   :  { %1261 = vsyncadd [#allocation3], 4294966272 }
  0x35   :  { %1262 = dma.done.wait [#allocation6], 9216  }
  0x36   :  { %1263 = vsyncadd [#allocation6], 4294958080  ;;  %v1096_v0 = vld [vmem:[#allocation5 + $0x40] sm:$0xff]   ;;  %v1100_v4 = vld [vmem:[#allocation5 + $0x48] sm:$0xff]   ;;  %vm1272_vm0 = vmmov 0   ;;  %s1273_s6 = smov [#allocation8]  }
  0x37   :  { %v1097_v1 = vld [vmem:[#allocation5 + $0xc0] sm:$0xff]   ;;  %971 = vmatprep.subr.bf16.mxu0 %v1096_v0  ;;  %v1101_v5 = vld [vmem:[#allocation5 + $0xc8] sm:$0xff]   ;;  %v1104_v8 = vld [vmem:[#allocation5 + $0x50] sm:$0xff]   ;;  %s887_s7 = sshll.u32 %s1273_s6, 4  ;;  %s888_s7 = int_to_ptr.vmem [resolvable:$true] %s887_s7 }
  0x38   :  { %v1098_v2 = vld [vmem:[#allocation5] sm:$0xff]   ;;  %993 = vmatprep.subr.bf16.mxu1 %v1097_v1  ;;  %v1102_v6 = vld [vmem:[#allocation5 + $0x8] sm:$0xff]   ;;  %v1105_v9 = vld [vmem:[#allocation5 + $0xd0] sm:$0xff]   ;;  %p1243_p11 = scmp.lt.s32.totalorder %s888_s7, %s888_s7 }
  0x39   :  { %v1099_v3 = vld [vmem:[#allocation5 + $0x80] sm:$0xff]   ;;  %972 = vmatpush3.bf16.msra.mxu0 %v1098_v2  ;;  %v1103_v7 = vld [vmem:[#allocation5 + $0x88] sm:$0xff]   ;;  %v1106_v10 = vld [vmem:[#allocation5 + $0x10] sm:$0xff]  }
  0x3a   :  { %994 = vmatpush3.bf16.msra.mxu1 %v1099_v3  ;;  %973 = vmatprep.subr.bf16.mxu0 %v1100_v4  ;;  %v1107_v11 = vld [vmem:[#allocation5 + $0x90] sm:$0xff]   ;;  %v1108_v12 = vld [vmem:[#allocation5 + $0x58] sm:$0xff]   ;;  %v1112_v16 = vld [vmem:[#allocation5 + $0x60] sm:$0xff]  }
  0x3b   :  { %995 = vmatprep.subr.bf16.mxu1 %v1101_v5  ;;  %v1109_v13 = vld [vmem:[#allocation5 + $0xd8] sm:$0xff]   ;;  %v1113_v17 = vld [vmem:[#allocation5 + $0xe0] sm:$0xff]   ;;  %v1116_v20 = vld [vmem:[#allocation5 + $0x68] sm:$0xff]  }
  0x3c   :  { %v1110_v14 = vld [vmem:[#allocation5 + $0x18] sm:$0xff]   ;;  %v1114_v18 = vld [vmem:[#allocation5 + $0x20] sm:$0xff]   ;;  %v1117_v21 = vld [vmem:[#allocation5 + $0xe8] sm:$0xff]  }
  0x3d   :  { %974 = vmatpush3.bf16.msra.mxu0 %v1102_v6  ;;  %v1111_v15 = vld [vmem:[#allocation5 + $0x98] sm:$0xff]   ;;  %v1115_v19 = vld [vmem:[#allocation5 + $0xa0] sm:$0xff]   ;;  %v1118_v22 = vld [vmem:[#allocation5 + $0x28] sm:$0xff]  }
  0x3e   :  { %996 = vmatpush3.bf16.msra.mxu1 %v1103_v7  ;;  %975 = vmatprep.subr.bf16.mxu0 %v1104_v8  ;;  %v1119_v23 = vld [vmem:[#allocation5 + $0xa8] sm:$0xff]   ;;  %v1120_v24 = vld [vmem:[#allocation5 + $0x70] sm:$0xff]   ;;  %v1124_v28 = vld [vmem:[#allocation5 + $0x78] sm:$0xff]  }
  0x3f   :  { %997 = vmatprep.subr.bf16.mxu1 %v1105_v9  ;;  %v1121_v25 = vld [vmem:[#allocation5 + $0xf0] sm:$0xff]   ;;  %v1125_v29 = vld [vmem:[#allocation5 + $0xf8] sm:$0xff]   ;;  %v62_v32 = vld [vmem:[#allocation2 + $0x8] sm:$0xff] }
  0x40   :  { %v1122_v26 = vld [vmem:[#allocation5 + $0x30] sm:$0xff]   ;;  %v1126_v30 = vld [vmem:[#allocation5 + $0x38] sm:$0xff]   ;;  %v61_v34 = vld [vmem:[#allocation2] sm:$0xff]  ;;  %v70_v35 = vpack.c.bf16 %v62_v32, %v62_v32 }
  0x41   :  { %976 = vmatpush3.bf16.msra.mxu0 %v1106_v10  ;;  %v1123_v27 = vld [vmem:[#allocation5 + $0xb0] sm:$0xff]   ;;  %v1127_v31 = vld [vmem:[#allocation5 + $0xb8] sm:$0xff]   ;;  %v69_v37 = vpack.c.bf16 %v61_v34, %v61_v34  ;;  %v1128_v40 = vld [vmem:[#allocation5 + $0x140] sm:$0xff]  }
  0x42   :  { %998 = vmatpush3.bf16.msra.mxu1 %v1107_v11  ;;  %977 = vmatprep.subr.bf16.mxu0 %v1108_v12  ;;  %v64_v33 = vld [vmem:[#allocation2 + $0x18] sm:$0xff]  ;;  %v63_v38 = vld [vmem:[#allocation2 + $0x10] sm:$0xff]  ;;  %v1129_v41 = vld [vmem:[#allocation5 + $0x1c0] sm:$0xff]  }
  0x43   :  { %999 = vmatprep.subr.bf16.mxu1 %v1109_v13  ;;  %v72_v36 = vpack.c.bf16 %v64_v33, %v64_v33  ;;  %v71_v39 = vpack.c.bf16 %v63_v38, %v63_v38  ;;  %628 = vmatprep.mubr.bf16.mxu0 %v70_v35  ;;  %v1130_v42 = vld [vmem:[#allocation5 + $0x100] sm:$0xff]   ;;  %v1132_v44 = vld [vmem:[#allocation5 + $0x148] sm:$0xff]   ;;  %v1136_v48 = vld [vmem:[#allocation5 + $0x150] sm:$0xff]  }
  0x44   :  { %v1131_v43 = vld [vmem:[#allocation5 + $0x180] sm:$0xff]   ;;  %v1133_v45 = vld [vmem:[#allocation5 + $0x1c8] sm:$0xff]   ;;  %v1137_v49 = vld [vmem:[#allocation5 + $0x1d0] sm:$0xff]  }
  0x45   :  { %978 = vmatpush3.bf16.msra.mxu0 %v1110_v14  ;;  %668 = vmatprep.mubr.bf16.mxu1 %v72_v36  ;;  %v1134_v46 = vld [vmem:[#allocation5 + $0x108] sm:$0xff]   ;;  %v1138_v50 = vld [vmem:[#allocation5 + $0x110] sm:$0xff]   ;;  %v1140_v52 = vld [vmem:[#allocation5 + $0x158] sm:$0xff]  }
  0x46   :  { %1000 = vmatpush3.bf16.msra.mxu1 %v1111_v15  ;;  %979 = vmatprep.subr.bf16.mxu0 %v1112_v16  ;;  %v1135_v47 = vld [vmem:[#allocation5 + $0x188] sm:$0xff]   ;;  %v1139_v51 = vld [vmem:[#allocation5 + $0x190] sm:$0xff]   ;;  %v1141_v53 = vld [vmem:[#allocation5 + $0x1d8] sm:$0xff]  }
  0x47   :  { %1001 = vmatprep.subr.bf16.mxu1 %v1113_v17  ;;  %v1142_v54 = vld [vmem:[#allocation5 + $0x118] sm:$0xff]   ;;  %v1144_v56 = vld [vmem:[#allocation5 + $0x160] sm:$0xff]   ;;  %v1148_v60 = vld [vmem:[#allocation5 + $0x168] sm:$0xff]   ;;  %v1271_v17 = vmov 0.0  }
  0x48   :  { %v1143_v55 = vld [vmem:[#allocation5 + $0x198] sm:$0xff]   ;;  %v1145_v57 = vld [vmem:[#allocation5 + $0x1e0] sm:$0xff]   ;;  %v1149_v61 = vld [vmem:[#allocation5 + $0x1e8] sm:$0xff]  }
  0x49   :  { %980 = vmatpush3.bf16.msra.mxu0 %v1114_v18  ;;  %v1146_v58 = vld [vmem:[#allocation5 + $0x120] sm:$0xff]   ;;  %v1150_v62 = vld [vmem:[#allocation5 + $0x128] sm:$0xff]   ;;  %v1152_v0 = vld [vmem:[#allocation5 + $0x170] sm:$0xff]  }
  0x4a   :  { %1002 = vmatpush3.bf16.msra.mxu1 %v1115_v19  ;;  %981 = vmatprep.subr.bf16.mxu0 %v1116_v20  ;;  %v1147_v59 = vld [vmem:[#allocation5 + $0x1a0] sm:$0xff]   ;;  %v1151_v63 = vld [vmem:[#allocation5 + $0x1a8] sm:$0xff]   ;;  %v1153_v1 = vld [vmem:[#allocation5 + $0x1f0] sm:$0xff]  }
  0x4b   :  { %1003 = vmatprep.subr.bf16.mxu1 %v1117_v21  ;;  %v1154_v2 = vld [vmem:[#allocation5 + $0x130] sm:$0xff]   ;;  %v1156_v4 = vld [vmem:[#allocation5 + $0x178] sm:$0xff]   ;;  %v66_v8 = vld [vmem:[#allocation2 + $0x28] sm:$0xff] }
  0x4c   :  { %v1155_v3 = vld [vmem:[#allocation5 + $0x1b0] sm:$0xff]   ;;  %v1157_v5 = vld [vmem:[#allocation5 + $0x1f8] sm:$0xff]   ;;  %v74_v10 = vpack.c.bf16 %v66_v8, %v66_v8  ;;  %v65_v12 = vld [vmem:[#allocation2 + $0x20] sm:$0xff] }
  0x4d   :  { %982 = vmatpush3.bf16.msra.mxu0 %v1118_v22  ;;  %v1158_v6 = vld [vmem:[#allocation5 + $0x138] sm:$0xff]   ;;  %v67_v13 = vld [vmem:[#allocation2 + $0x30] sm:$0xff]  ;;  %v73_v14 = vpack.c.bf16 %v65_v12, %v65_v12  ;;  %v1160_v16 = vld [vmem:[#allocation7] sm:$0xff]  }
  0x4e   :  { %1004 = vmatpush3.bf16.msra.mxu1 %v1119_v23  ;;  %983 = vmatprep.subr.bf16.mxu0 %v1120_v24  ;;  %v1159_v7 = vld [vmem:[#allocation5 + $0x1b8] sm:$0xff]   ;;  %v75_v15 = vpack.c.bf16 %v67_v13, %v67_v13  ;;  %v1161_v18 = vld [vmem:[#allocation7 + $0x8] sm:$0xff]   ;;  %v1162_v19 = vld [vmem:[#allocation7 + $0x10] sm:$0xff]  }
  0x4f   :  { %1005 = vmatprep.subr.bf16.mxu1 %v1121_v25  ;;  %v68_v9 = vld [vmem:[#allocation2 + $0x38] sm:$0xff]  ;;  %v1164_v21 = vld [vmem:[#allocation7 + $0x20] sm:$0xff]   ;;  %v1165_v22 = vld [vmem:[#allocation7 + $0x28] sm:$0xff]  }
  0x50   :  { %v76_v11 = vpack.c.bf16 %v68_v9, %v68_v9  ;;  %v1163_v20 = vld [vmem:[#allocation7 + $0x18] sm:$0xff]   ;;  %v1166_v23 = vld [vmem:[#allocation7 + $0x30] sm:$0xff]  }
  0x51   :  { %984 = vmatpush3.bf16.msra.mxu0 %v1122_v26  ;;  %v1167_v24 = vld [vmem:[#allocation7 + $0x38] sm:$0xff]  }
  0x52   :  { %1006 = vmatpush3.bf16.msra.mxu1 %v1123_v27  ;;  %985 = vmatprep.subr.bf16.mxu0 %v1124_v28  ;;  %v897_v27 = vld [vmem:[%s1366_s2] ss:$0 sm:$0xff] }
  0x53   :  { %1007 = vmatprep.subr.bf16.mxu1 %v1125_v29 }
  0x55   :  { %986 = vmatpush3.bf16.msra.mxu0 %v1126_v30 }
  0x56   :  { %1008 = vmatpush3.bf16.msra.mxu1 %v1127_v31  ;;  %1015 = vmatprep.subr.bf16.mxu0 %v1128_v40 }
  0x57   :  { %1037 = vmatprep.subr.bf16.mxu1 %v1129_v41 }
  0x58   :  { %629 = vmatmul.mubr.bf16.vlgmr.msra.gmra.mrb[0].mxu0 %v69_v37 }
  0x59   :  { %669 = vmatmul.mubr.bf16.vlgmr.msra.gmra.mrb[0].mxu1 %v71_v39  ;;  %1016 = vmatpush3.bf16.msra.mxu0 %v1130_v42 }
  0x5a   :  { %1038 = vmatpush3.bf16.msra.mxu1 %v1131_v43  ;;  %1017 = vmatprep.subr.bf16.mxu0 %v1132_v44 }
  0x5b   :  { %1039 = vmatprep.subr.bf16.mxu1 %v1133_v45  ;;  %708 = vmatprep.mubr.bf16.mxu0 %v74_v10 }
  0x5c   :  { %748 = vmatprep.mubr.bf16.mxu1 %v76_v11 }
  0x5d   :  { %1018 = vmatpush3.bf16.msra.mxu0 %v1134_v46 }
  0x5e   :  { %1040 = vmatpush3.bf16.msra.mxu1 %v1135_v47  ;;  %1019 = vmatprep.subr.bf16.mxu0 %v1136_v48 }
  0x5f   :  { %1041 = vmatprep.subr.bf16.mxu1 %v1137_v49 }
  0x61   :  { %1020 = vmatpush3.bf16.msra.mxu0 %v1138_v50 }
  0x62   :  { %1042 = vmatpush3.bf16.msra.mxu1 %v1139_v51  ;;  %1021 = vmatprep.subr.bf16.mxu0 %v1140_v52  ;;  %v962_v52 = vld [vmem:[%s1368_s4] ss:$0 sm:$0xff]  ;;  %s1238_s4 = scalar_lea.vmem %s888_s7, 64 }
  0x63   :  { %1043 = vmatprep.subr.bf16.mxu1 %v1141_v53  ;;  %p1239_p10 = scmp.ne.s32.totalorder %s888_s7, %s1238_s4  ;;  %p1244_p12 = scmp.lt.s32.totalorder %s1238_s4, %s1238_s4 }
  0x65   :  { %1022 = vmatpush3.bf16.msra.mxu0 %v1142_v54  ;;  %p1245_p13 = por %p1244_p12, %p1243_p11 }
  0x66   :  { %1044 = vmatpush3.bf16.msra.mxu1 %v1143_v55  ;;  %1023 = vmatprep.subr.bf16.mxu0 %v1144_v56 }
  0x67   :  { %1045 = vmatprep.subr.bf16.mxu1 %v1145_v57  ;;  %p1246_p0 = pnand %p1245_p13, %p1239_p10 }
  0x69   :  { %1024 = vmatpush3.bf16.msra.mxu0 %v1146_v58 }
  0x6a   :  { %1046 = vmatpush3.bf16.msra.mxu1 %v1147_v59  ;;  %1025 = vmatprep.subr.bf16.mxu0 %v1148_v60 }
  0x6b   :  { %1047 = vmatprep.subr.bf16.mxu1 %v1149_v61 }
  0x6d   :  { %1026 = vmatpush3.bf16.msra.mxu0 %v1150_v62 }
  0x6e   :  { %1048 = vmatpush3.bf16.msra.mxu1 %v1151_v63  ;;  %1027 = vmatprep.subr.bf16.mxu0 %v1152_v0 }
  0x6f   :  { %1049 = vmatprep.subr.bf16.mxu1 %v1153_v1 }
  0x71   :  { %1028 = vmatpush3.bf16.msra.mxu0 %v1154_v2 }
  0x72   :  { %1050 = vmatpush3.bf16.msra.mxu1 %v1155_v3  ;;  %1029 = vmatprep.subr.bf16.mxu0 %v1156_v4 }
  0x73   :  { %1051 = vmatprep.subr.bf16.mxu1 %v1157_v5 }
  0x75   :  { %1030 = vmatpush3.bf16.msra.mxu0 %v1158_v6 }
  0x76   :  { %1052 = vmatpush3.bf16.msra.mxu1 %v1159_v7  ;;  %1068 = vmatprep.subr.bf16.mxu0 %v1271_v17 }
  0x78   :  { %709 = vmatmul.mubr.bf16.vlgmr.msra.gmra.mrb[4].mxu0 %v73_v14 }
  0x79   :  { %749 = vmatmul.mubr.bf16.vlgmr.msra.gmra.mrb[4].mxu1 %v75_v15  ;;  %1069 = vmatpush3.bf16.msra.mxu0 %v1160_v16 }
  0x7a   :  { %1070 = vmatprep.subr.bf16.mxu0 %v1271_v17  ;;  %1084 = vmatprep.mubr.msk.bf16.mxu0 %vm1272_vm0, %v1271_v17 }
  0x7d   :  { %1071 = vmatpush3.bf16.msra.mxu0 %v1161_v18 }
  0x7e   :  { %1072 = vmatprep.subr.bf16.mxu0 %v1271_v17 }
  0x81   :  { %1073 = vmatpush3.bf16.msra.mxu0 %v1162_v19 }
  0x82   :  { %1074 = vmatprep.subr.bf16.mxu0 %v1271_v17 }
  0x85   :  { %1075 = vmatpush3.bf16.msra.mxu0 %v1163_v20 }
  0x86   :  { %1076 = vmatprep.subr.bf16.mxu0 %v1271_v17 }
  0x89   :  { %1077 = vmatpush3.bf16.msra.mxu0 %v1164_v21 }
  0x8a   :  { %1078 = vmatprep.subr.bf16.mxu0 %v1271_v17 }
  0x8d   :  { %1079 = vmatpush3.bf16.msra.mxu0 %v1165_v22 }
  0x8e   :  { %1080 = vmatprep.subr.bf16.mxu0 %v1271_v17 }
  0x91   :  { %1081 = vmatpush3.bf16.msra.mxu0 %v1166_v23 }
  0x92   :  { %1082 = vmatprep.subr.bf16.mxu0 %v1271_v17 }
  0x95   :  { %1083 = vmatpush3.bf16.msra.mxu0 %v1167_v24 }
 0x12b   :  { %v987_v25 = vpop.f32.mrb[0].mxu0 }
 0x12c   :  { %v1009_v26 = vpop.f32.mrb[0].mxu1  ;;  %v988_v28 = vpop.f32.mrb[1].mxu0 }
 0x12d   :  { %v1010_v29 = vpop.f32.mrb[1].mxu1  ;;  %v989_v30 = vadd.f32 %v988_v28, %v987_v25  ;;  %v990_v32 = vpop.f32.mrb[2].mxu0 }
 0x12e   :  { %v1011_v31 = vadd.f32 %v1010_v29, %v1009_v26  ;;  %v1012_v33 = vpop.f32.mrb[2].mxu1  ;;  %v991_v34 = vpop.f32.mrb[3].mxu0 }
 0x12f   :  { %v1013_v35 = vpop.f32.mrb[3].mxu1  ;;  %v631_v36 = vadd.f32 %v989_v30, %v897_v27 }
 0x131   :  { %v671_v37 = vadd.f32 %v1011_v31, %v631_v36 }
 0x14b   :  { %v1031_v38 = vpop.f32.mrb[4].mxu0 }
 0x14c   :  { %v1053_v39 = vpop.f32.mrb[4].mxu1  ;;  %v1032_v40 = vpop.f32.mrb[5].mxu0 }
 0x14d   :  { %v1033_v41 = vadd.f32 %v1032_v40, %v1031_v38  ;;  %v1054_v42 = vpop.f32.mrb[5].mxu1  ;;  %v1034_v43 = vpop.f32.mrb[6].mxu0 }
 0x14e   :  { %v1055_v44 = vadd.f32 %v1054_v42, %v1053_v39  ;;  %v1056_v45 = vpop.f32.mrb[6].mxu1  ;;  %v1035_v46 = vpop.f32.mrb[7].mxu0 }
 0x14f   :  { %v711_v47 = vadd.f32 %v1033_v41, %v671_v37  ;;  %v1057_v48 = vpop.f32.mrb[7].mxu1 }
 0x151   :  { %v751_v49 = vadd.f32 %v1055_v44, %v711_v47 }
 0x153   :  { %v756_v50 = vmax.f32 %v751_v49, 0.0 }
 0x155   :  { %v757_v51 = vpack.c.bf16 %v756_v50, %v756_v50 }
 0x157   :  { %1085 = vmatmul.mubr.bf16.vlgmr.msra.gmra.mrb[8].mxu0 %v757_v51 }
 0x22a   :  { %v863_v53 = vpop.f32.mrb[8].mxu0 }
 0x22b   :  { %v864_v54 = vadd.f32 %v962_v52, %v863_v53  ;;  %v1086_v55 = vpop.f32.mrb[9].mxu0 }
 0x22c   :  { %v866_v56 = vpop.f32.mrb[10].mxu0 }
 0x22d   :  { %869 = vmax.xlane.f32.xlu0 %v864_v54  ;;  %v1087_v57 = vpop.f32.mrb[11].mxu0 }
 0x2ba   :  { %v870_v58 = vpop.xlane.xlu0 %869 }
 0x2bb   :  { %v871_v59 = vsub.f32 %v864_v54, %v870_v58 }
 0x2bd   :  { %v872_v60 = vmul.f32 1.442695, %v871_v59 }
 0x2bf   :  { %1168 = vpow2.f32 %v872_v60 }
 0x2c9   :  { %v1169_v61 = vpop.eup %1168 }
 0x2ca   :  { %874 = vadd.xlane.f32.xlu0 %v1169_v61 }
 0x357   :  { %v875_v62 = vpop.xlane.xlu0 %874 }
 0x358   :  { %1170 = vlog2.f32 %v875_v62 }
 0x362   :  { %v1171_v63 = vpop.eup %1170 }
 0x363   :  { %v877_v0 = vmul.f32 0.6931472, %v1171_v63 }
 0x365   :  { %v878_v1 = vsub.f32 %v871_v59, %v877_v0 }
 0x367   :  { %v879_v2 = vpack.c.bf16 %v878_v1, %v878_v1 }
 0x369   :  { %880 = vst [vmem:[#allocation8] sm:$0xf] %v879_v2 }
 0x36a   :  { %1249 = shalt.err (!%p1246_p0)
}
 0x36b   :  { %s1250_s10 = scalar_lea.hbm %s1369_s5, 64 }
 0x36c   :  { %p1251_p1 = scmp.ne.s32.totalorder %s1369_s5, %s1250_s10  ;;  %p1254_p2 = scmp.lt.u32.totalorder %s1250_s10, %s1369_s5 }
 0x36e   :  { %p1256_p3 = pnand %p1254_p2, %p1251_p1 }
 0x370   :  { %1259 = shalt.err (!%p1256_p3)
}
 0x371   :  { %890 = dma.vmem_to_hbm [thread:$0]  %s888_s7, 64, %s1369_s5, [#allocation4]  }
 0x372   :  { %1264 = dma.done.wait [#allocation4], 64  }
 0x373   :  { %1265 = vsyncadd [#allocation4], 4294967232 }
 0x374   :  { %894 = vsyncpa [#allocation3], 1 }
 0x375   :  { %895 = vsyncpa [#allocation6], 1 }
 0x376   :  { %896 = vsyncpa [#allocation4], 1 }

</bundles_post_ra>
